<compile_context>
chip_gen: v5e
topology: v5e:2x2
jax: 0.10.0
libtpu: 0.0.40
codegen_flags: <defaults>
</compile_context>

<pallas_src>
import math
from dataclasses import dataclass

import numpy as np
import jax
import jax.numpy as jnp
from jax import lax
from jax.experimental import pallas as pl
from jax.experimental.pallas import tpu as pltpu

_VMEM_LIMIT = 32 * 1024 * 1024  # raises v5e's 16 MiB scoped default; matches v6e/v7x


# ----------------------------------------------------------------------------
# Kernel 1: bilinear-resize (as two MXU matmuls) + binarize + 2x2 token-mask
# ----------------------------------------------------------------------------
def _mask_kernel(wy_ref, m_ref, wxT_ref, ph_ref, pwT_ref, out_m_ref, out_tok_ref):
    m = m_ref[0]                                                         # (H, W) bf16
    r1 = jnp.dot(wy_ref[...], m, preferred_element_type=jnp.float32)     # (h, W) f32
    resized = jnp.dot(r1.astype(jnp.bfloat16), wxT_ref[...],
                      preferred_element_type=jnp.float32)                # (h, w) f32
    # mask[mask > 0] = 1   (upstream mask is non-negative 0/1, so exact)
    binar = jnp.where(resized > 0, 1.0, resized)
    out_m_ref[0] = binar
    # 2x2 patch sum (pooling matmuls); x16 repeated channels; >0.5 threshold fused
    p1 = jnp.dot(ph_ref[...], binar.astype(jnp.bfloat16),
                 preferred_element_type=jnp.float32)                     # (h//2, w)
    pool = jnp.dot(p1.astype(jnp.bfloat16), pwT_ref[...],
                   preferred_element_type=jnp.float32)                   # (h//2, w//2)
    out_tok_ref[0] = ((pool * 16.0) > 0.5).astype(jnp.int32)             # 1 = masked token


def resize_binarize_tokens(mask_bhw_bf16, wy, wxT, ph, pwT):
    bs, H, W = mask_bhw_bf16.shape
    h, w = wy.shape[0], wxT.shape[1]
    ht, wt = ph.shape[0], pwT.shape[1]
    # TODO(synk): for >=2K-pixel masks, add a second grid axis over output rows h so
    # the (H,W) block stays bounded; at the shapes used here a single block is fine.
    return pl.pallas_call(
        _mask_kernel,
        out_shape=(jax.ShapeDtypeStruct((bs, h, w), jnp.float32),
                   jax.ShapeDtypeStruct((bs, ht, wt), jnp.int32)),
        grid=(bs,),
        in_specs=[pl.BlockSpec((h, H), lambda b: (0, 0)),
                  pl.BlockSpec((1, H, W), lambda b: (b, 0, 0)),
                  pl.BlockSpec((W, w), lambda b: (0, 0)),
                  pl.BlockSpec((ht, h), lambda b: (0, 0)),
                  pl.BlockSpec((w, wt), lambda b: (0, 0))],
        out_specs=(pl.BlockSpec((1, h, w), lambda b: (b, 0, 0)),
                   pl.BlockSpec((1, ht, wt), lambda b: (b, 0, 0))),
        compiler_params=pltpu.CompilerParams(
            dimension_semantics=("parallel",), vmem_limit_bytes=_VMEM_LIMIT),
    )(wy, mask_bhw_bf16, wxT, ph, pwT)


# ----------------------------------------------------------------------------
# Kernel 2: compact attention mask / scale
#   label: 0 = text token, 1 = masked image token, 2 = background image token
#   dense rule: A[i,j] = (label_i==0) | (label_j==0) | (label_i==label_j)
#   Only 3 distinct row types exist, so we emit a (3,S) row-pattern table + labels
#   instead of the (S,S) mask (pure-HBM-write-bound in the previous version).
# ----------------------------------------------------------------------------
def _attn_compact_kernel(scale_ref, lc_ref, pat_ref, scl_ref):
    lc = lc_ref[...]                                    # (1, S) int32 column labels
    rows, S = pat_ref.shape                             # rows padded to 8 for layout
    r = lax.broadcasted_iota(jnp.int32, (rows, S), 0)   # row index == row label
    allowed = (r == 0) | (lc == 0) | (lc == r)          # (rows, S) bool
    pat_ref[...] = allowed.astype(jnp.int32)
    scl_ref[...] = jnp.where(lc == 2, scale_ref[0], 0.0).astype(jnp.bfloat16)


def attn_row_patterns(labels_1s, scale_val):
    S = labels_1s.shape[1]
    scale_arr = jnp.array([scale_val], dtype=jnp.float32)
    pat, scl = pl.pallas_call(
        _attn_compact_kernel,
        out_shape=(jax.ShapeDtypeStruct((8, S), jnp.int32),
                   jax.ShapeDtypeStruct((1, S), jnp.bfloat16)),
        grid=(1,),
        in_specs=[pl.BlockSpec(memory_space=pltpu.MemorySpace.SMEM),
                  pl.BlockSpec((1, S), lambda i: (0, 0))],
        out_specs=(pl.BlockSpec((8, S), lambda i: (0, 0)),
                   pl.BlockSpec((1, S), lambda i: (0, 0))),
        compiler_params=pltpu.CompilerParams(dimension_semantics=("arbitrary",)),
    )(scale_arr, labels_1s)
    return pat[:3], scl                                 # (3,S) row patterns, (1,S) bf16


def expand_attention_mask(row_patterns, labels):
    """Plain-JAX lazy expansion to the dense (1, S, S) bool mask, for consumers that
    genuinely need the materialized form (not called in this forward pass)."""
    return (jnp.take(row_patterns, labels, axis=0) != 0)[None]


# ----------------------------------------------------------------------------
# Kernel 3: FUSED Euler denoise loop with a surrogate velocity model + masked merge
#   v = tanh(img @ W1 + vec @ Wv + t) @ W2 * guidance ;  img += (t_prev - t_curr) * v
#   final:  out = img0 + token_mask * (img_final - img0)   (== z0[:, idx] = z_fe)
# The whole timestep loop runs inside one pallas_call: schedule in SMEM, weights
# loaded once per grid step, hv = vec @ Wv hoisted, the evolving state accumulates
# directly in the resident output VMEM block (no scratch), and the grid is tiled
# over (batch, L-tiles) so both v7x TensorCores are busy.
# TODO(synk): the real denoise_kv_inf runs the full Flux_kv transformer with KV
# injection; that model is not translatable here, so a deterministic fused-linear
# surrogate supplies the per-step velocity with identical Euler-loop semantics.
# TODO(synk): lane-dense (bs, L*d//128, 128) output + input_output_aliases were
# skipped to keep the fused masked-merge layout simple and avoid eager-mode
# donation hazards; the final store happens once per grid point so the cost is small.
# ----------------------------------------------------------------------------
def _denoise_kernel(sched_ref, img_ref, mask_ref, vec_ref, w1_ref, wv_ref, w2_ref,
                    out_ref):
    # sched_ref: SMEM f32, [guidance, t_0, t_1, ..., t_n]
    n_steps = sched_ref.shape[0] - 2
    g = sched_ref[0]
    out_ref[0] = img_ref[0]                                              # (TL, D) f32
    # timestep-invariant: hoisted out of the step loop
    hv = jnp.dot(vec_ref[0].astype(jnp.bfloat16), wv_ref[...],
                 preferred_element_type=jnp.float32)                     # (1, hid)

    def body(i, carry):
        t_curr = sched_ref[1 + i]
        t_prev = sched_ref[2 + i]
        x = out_ref[0]
        h1 = jnp.dot(x.astype(jnp.bfloat16), w1_ref[...],
                     preferred_element_type=jnp.float32)                 # (TL, hid)
        hact = jnp.tanh(h1 + hv + t_curr)                                # EUP/VPU
        v = jnp.dot(hact.astype(jnp.bfloat16), w2_ref[...],
                    preferred_element_type=jnp.float32) * g              # (TL, D)
        out_ref[0] = x + (t_prev - t_curr) * v
        return carry

    unroll = True if n_steps <= 8 else 4      # steps are serially dependent; cap unroll
    lax.fori_loop(0, n_steps, body, 0, unroll=unroll)

    # fused masked merge: z0[:, mask_indices, ...] = z_fe  (1 = masked token)
    tok = mask_ref[0]                                                    # (TL, 1) f32
    img0 = img_ref[0]
    out_ref[0] = img0 + tok * (out_ref[0] - img0)


def _pick_l_tile(L, target=256):
    if L <= target:
        return L
    for t in range(target, 7, -8):
        if L % t == 0:
            return t
    return L


def denoise_merge_fused(img, tok_f, vec, w1, wv, w2, timesteps, guidance):
    bs, L, d = img.shape
    dv = vec.shape[-1]
    hid = w1.shape[1]
    if len(timesteps) < 2:
        return img
    tl = _pick_l_tile(L)
    n_lt = L // tl
    sched = jnp.asarray([guidance] + [float(t) for t in timesteps], dtype=jnp.float32)
    vec3 = vec.reshape(bs, 1, dv)
    return pl.pallas_call(
        _denoise_kernel,
        out_shape=jax.ShapeDtypeStruct((bs, L, d), jnp.float32),
        grid=(bs, n_lt),
        in_specs=[pl.BlockSpec(memory_space=pltpu.MemorySpace.SMEM),
                  pl.BlockSpec((1, tl, d), lambda b, l: (b, l, 0)),
                  pl.BlockSpec((1, tl, 1), lambda b, l: (b, l, 0)),
                  pl.BlockSpec((1, 1, dv), lambda b, l: (b, 0, 0)),
                  pl.BlockSpec((d, hid), lambda b, l: (0, 0)),
                  pl.BlockSpec((dv, hid), lambda b, l: (0, 0)),
                  pl.BlockSpec((hid, d), lambda b, l: (0, 0))],
        out_specs=pl.BlockSpec((1, tl, d), lambda b, l: (b, l, 0)),
        compiler_params=pltpu.CompilerParams(
            dimension_semantics=("parallel", "parallel"),
            vmem_limit_bytes=_VMEM_LIMIT),
    )(sched, img, tok_f, vec3, w1, wv, w2)


# ----------------------------------------------------------------------------
# Plain-JAX glue
# ----------------------------------------------------------------------------
def bilinear_matrix(out_size, in_size):
    """PyTorch F.interpolate(mode='bilinear', align_corners=False) as a matrix."""
    W = np.zeros((out_size, in_size), dtype=np.float32)
    if in_size == 1:
        W[:, 0] = 1.0
        return W
    scale = in_size / out_size
    for i in range(out_size):
        src = (i + 0.5) * scale - 0.5
        x0 = int(np.floor(src))
        frac = src - x0
        x0c = min(max(x0, 0), in_size - 1)
        x1c = min(max(x0 + 1, 0), in_size - 1)
        W[i, x0c] += 1.0 - frac
        W[i, x1c] += frac
    return W


def pooling_matrix(out_size):
    P = np.zeros((out_size, out_size * 2), dtype=np.float32)
    for i in range(out_size):
        P[i, 2 * i] = 1.0
        P[i, 2 * i + 1] = 1.0
    return P


def get_schedule(num_steps, image_seq_len, base_shift=0.5, max_shift=1.15, shift=True):
    with np.errstate(divide="ignore"):
        timesteps = np.linspace(1.0, 0.0, num_steps + 1)
        if shift:
            m = (max_shift - base_shift) / (4096 - 256)
            b = base_shift - m * 256
            mu = m * image_seq_len + b
            timesteps = math.exp(mu) / (math.exp(mu) + (1.0 / timesteps - 1.0))
    return [float(t) for t in timesteps]


def unpack(x, height, width):
    b, L, D = x.shape
    h = math.ceil(height / 16)
    w = math.ceil(width / 16)
    c = D // 4
    x = x.reshape(b, h, w, c, 2, 2)
    x = jnp.transpose(x, (0, 3, 1, 4, 2, 5))
    return x.reshape(b, c, h * 2, w * 2)


@dataclass
class Opts:
    height: int
    width: int
    attn_mask: bool = True
    attn_scale: float = 0.5
    denoise_num_steps: int = 4
    skip_step: int = 0
    inversion_guidance: float = 1.0
    denoise_guidance: float = 3.5


class FluxKVEditInfPallas:
    """JAX/Pallas re-implementation of Flux_kv_edit_inf.forward."""

    TEXT_LEN = 512

    def __init__(self, key, d_img=64, d_vec=32, hidden=256, name="flux-dev"):
        self.name = name
        k1, k2, k3 = jax.random.split(key, 3)
        # deterministic synthetic weights for the surrogate velocity model (bf16 for MXU);
        # hidden=256 fills the 256-wide MXU columns on v6e/v7x.
        self.w1 = (0.02 * jax.random.normal(k1, (d_img, hidden), jnp.float32)).astype(jnp.bfloat16)
        self.wv = (0.02 * jax.random.normal(k2, (d_vec, hidden), jnp.float32)).astype(jnp.bfloat16)
        self.w2 = (0.02 * jax.random.normal(k3, (hidden, d_img), jnp.float32)).astype(jnp.bfloat16)

    def forward(self, inp, inp_target, mask, opts: Opts):
        info = {"feature": {}}
        bs, L, d = inp["img"].shape
        h = opts.height // 8
        w = opts.width // 8
        ht, wt = h // 2, w // 2

        # --- mask: bilinear resize -> binarize -> token mask (threshold fused in-kernel)
        Hm, Wm = mask.shape[-2:]
        wy = jnp.asarray(bilinear_matrix(h, Hm), dtype=jnp.bfloat16)
        wxT = jnp.asarray(bilinear_matrix(w, Wm).T, dtype=jnp.bfloat16)
        ph = jnp.asarray(pooling_matrix(ht), dtype=jnp.bfloat16)
        pwT = jnp.asarray(pooling_matrix(wt).T, dtype=jnp.bfloat16)
        # perf: ship the full-res mask as bf16 (half the HBM DMA bytes; 0/1 masks exact)
        mask_bhw = mask[:, 0, :, :].astype(jnp.bfloat16)
        mask_hw, tok_i32 = resize_binarize_tokens(mask_bhw, wy, wxT, ph, pwT)

        # info['mask'] : (b, L, 64) == each token's 2x2 patch tiled over the 16 repeated
        # channels (cheap tile of a (b,L,4) slab instead of a 16x broadcast + rearrange).
        patch4 = mask_hw.reshape(bs, ht, 2, wt, 2)
        patch4 = jnp.transpose(patch4, (0, 1, 3, 2, 4)).reshape(bs, L, 4)
        info["mask"] = jnp.tile(patch4, (1, 1, 16))

        tok_mask = tok_i32.reshape(bs, L)                 # int32 0/1 per token
        bool_mask = tok_mask != 0                         # (b, L) bool, traced

        # --- attention mask / scale (unconditionally traced; the original gates this on
        # `(~bool_mask).any()`, a device->host sync that serializes the pipeline; the
        # surrogate denoise does not consume it and the returned z0 is unaffected).
        attention_mask = None
        attention_scale = None
        if opts.attn_mask or opts.attn_scale != 0:
            # union over batch matches torch.nonzero(bool_mask)[:, 1] in the reference
            tok_any = jnp.any(bool_mask, axis=0).astype(jnp.int32)          # (L,)
            labels = jnp.concatenate(
                [jnp.zeros((self.TEXT_LEN,), jnp.int32),
                 2 - tok_any]).reshape(1, -1)             # 0=text, 1=masked, 2=background
            row_pat, ascale = attn_row_patterns(labels, float(opts.attn_scale))
            if opts.attn_mask:
                # compact representation; use expand_attention_mask(...) for dense (1,S,S)
                attention_mask = {"row_patterns": row_pat, "labels": labels[0]}
            if opts.attn_scale != 0:
                attention_scale = ascale[None]            # (1, 1, S) bf16
        info["attention_mask"] = attention_mask
        info["attention_scale"] = attention_scale

        # --- denoise schedule
        timesteps = get_schedule(opts.denoise_num_steps, L,
                                 shift=(self.name != "flux-schnell"))
        timesteps = timesteps[opts.skip_step:]

        # --- fused denoise Euler loop + masked merge (single pallas_call)
        z0 = inp["img"].astype(jnp.float32)
        info["inject"] = True
        tok_f = bool_mask.astype(jnp.float32)[:, :, None]                  # (b, L, 1)
        if len(timesteps) >= 2:
            z_merged = denoise_merge_fused(z0, tok_f, inp_target["vec"],
                                           self.w1, self.wv, self.w2,
                                           timesteps, float(opts.denoise_guidance))
        else:
            z_merged = z0

        # mask_indices (host-sync nonzero) computed only AFTER the denoise work has been
        # dispatched so the sync overlaps with device compute. Not jit-compatible.
        info["mask_indices"] = jnp.nonzero(bool_mask)[1]

        z0 = unpack(z_merged.astype(jnp.float32), opts.height, opts.width)
        return z0


if __name__ == "__main__":
    key = jax.random.PRNGKey(0)
    k_model, k_img, k_txt, k_vec, k_txt2, k_vec2 = jax.random.split(key, 6)

    opts = Opts(height=64, width=64, attn_mask=True, attn_scale=0.5,
                denoise_num_steps=4, skip_step=0,
                inversion_guidance=1.0, denoise_guidance=3.5)

    bs = 1
    h, w = opts.height // 8, opts.width // 8          # 8, 8
    L = (h // 2) * (w // 2)                            # 16 tokens
    d = 64                                             # 16 * 2 * 2
    d_vec, d_txt, n_txt = 32, 32, 512

    inp = {
        "img": jax.random.normal(k_img, (bs, L, d), jnp.float32),
        "img_ids": jnp.zeros((bs, L, 3), jnp.float32),
        "txt": jax.random.normal(k_txt, (bs, n_txt, d_txt), jnp.float32),
        "txt_ids": jnp.zeros((bs, n_txt, 3), jnp.float32),
        "vec": jax.random.normal(k_vec, (bs, d_vec), jnp.float32),
    }
    inp_target = {
        "txt": jax.random.normal(k_txt2, (bs, n_txt, d_txt), jnp.float32),
        "txt_ids": jnp.zeros((bs, n_txt, 3), jnp.float32),
        "vec": jax.random.normal(k_vec2, (bs, d_vec), jnp.float32),
    }

    # deterministic full-resolution edit mask: a square region => some masked
    # tokens and some background tokens
    mask_np = np.zeros((bs, 1, opts.height, opts.width), dtype=np.float32)
    mask_np[:, :, 8:40, 8:40] = 1.0
    mask = jnp.asarray(mask_np)

    model = FluxKVEditInfPallas(k_model, d_img=d, d_vec=d_vec, hidden=256)
    z0 = model.forward(inp, inp_target, mask, opts)
    jax.block_until_ready(z0)
    assert z0.shape == (bs, d // 4, h, w)
    assert bool(jnp.all(jnp.isfinite(z0)))
    print("KERNEL_OK")
</pallas_src>

<mosaic_0001>
module attributes {stable_mosaic.version = 11 : i64} {
  func.func @_mask_kernel(%arg0: i32, %arg1: memref<8x64xbf16, #tpu.memory_space<vmem>>, %arg2: memref<1x64x64xbf16, #tpu.memory_space<vmem>>, %arg3: memref<64x8xbf16, #tpu.memory_space<vmem>>, %arg4: memref<4x8xbf16, #tpu.memory_space<vmem>>, %arg5: memref<8x4xbf16, #tpu.memory_space<vmem>>, %arg6: memref<1x8x8xf32, #tpu.memory_space<vmem>>, %arg7: memref<1x4x4xi32, #tpu.memory_space<vmem>>) attributes {dimension_semantics = [#tpu.dimension_semantics<parallel>], iteration_bounds = array<i64: 1>, scalar_prefetch = 0 : i64, scratch_operands = 0 : i64, tpu.core_type = #tpu.core_type<tc>, window_params = [{pipeline_mode = #tpu.pipeline_mode<synchronous>, transform_indices = @transform_0, window_bounds = array<i64: 8, 64>}, {transform_indices = @transform_1, window_bounds = array<i64: 1, 64, 64>}, {pipeline_mode = #tpu.pipeline_mode<synchronous>, transform_indices = @transform_2, window_bounds = array<i64: 64, 8>}, {pipeline_mode = #tpu.pipeline_mode<synchronous>, transform_indices = @transform_3, window_bounds = array<i64: 4, 8>}, {pipeline_mode = #tpu.pipeline_mode<synchronous>, transform_indices = @transform_4, window_bounds = array<i64: 8, 4>}, {transform_indices = @transform_5, window_bounds = array<i64: 1, 8, 8>}, {transform_indices = @transform_6, window_bounds = array<i64: 1, 4, 4>}]} {
    %c0 = arith.constant 0 : index
    %c0_0 = arith.constant 0 : index
    %c0_1 = arith.constant 0 : index
    %0 = vector.load %arg2[%c0, %c0_0, %c0_1] : memref<1x64x64xbf16, #tpu.memory_space<vmem>>, vector<1x64x64xbf16>
    %1 = vector.shape_cast %0 : vector<1x64x64xbf16> to vector<64x64xbf16>
    %c0_2 = arith.constant 0 : index
    %c0_3 = arith.constant 0 : index
    %2 = vector.load %arg1[%c0_2, %c0_3] : memref<8x64xbf16, #tpu.memory_space<vmem>>, vector<8x64xbf16>
    %cst = arith.constant dense<0.000000e+00> : vector<8x64xf32>
    %3 = tpu.matmul %2, %1, %cst {dimension_numbers = #tpu.dot_dimension_numbers<[1], [0], [0], [1], [0, 0, 1, 1], [], []>} : vector<8x64xbf16>, vector<64x64xbf16>, vector<8x64xf32> -> vector<8x64xf32>
    %4 = arith.truncf %3 : vector<8x64xf32> to vector<8x64xbf16>
    %c0_4 = arith.constant 0 : index
    %c0_5 = arith.constant 0 : index
    %5 = vector.load %arg3[%c0_4, %c0_5] : memref<64x8xbf16, #tpu.memory_space<vmem>>, vector<64x8xbf16>
    %cst_6 = arith.constant dense<0.000000e+00> : vector<8x8xf32>
    %6 = tpu.matmul %4, %5, %cst_6 {dimension_numbers = #tpu.dot_dimension_numbers<[1], [0], [0], [1], [0, 0, 1, 1], [], []>} : vector<8x64xbf16>, vector<64x8xbf16>, vector<8x8xf32> -> vector<8x8xf32>
    %cst_7 = arith.constant 0.000000e+00 : f32
    %7 = vector.broadcast %cst_7 : f32 to vector<8x8xf32>
    %8 = arith.cmpf ogt, %6, %7 : vector<8x8xf32>
    %cst_8 = arith.constant 1.000000e+00 : f32
    %9 = vector.broadcast %cst_8 : f32 to vector<8x8xf32>
    %10 = arith.select %8, %9, %6 : vector<8x8xi1>, vector<8x8xf32>
    %c0_9 = arith.constant 0 : index
    %c0_10 = arith.constant 0 : index
    %c0_11 = arith.constant 0 : index
    %11 = vector.load %arg6[%c0_9, %c0_10, %c0_11] : memref<1x8x8xf32, #tpu.memory_space<vmem>>, vector<1x8x8xf32>
    %12 = vector.shape_cast %11 : vector<1x8x8xf32> to vector<8x8xf32>
    %13 = vector.shape_cast %10 : vector<8x8xf32> to vector<1x8x8xf32>
    tpu.vector_store %arg6[%c0_9, %c0_10, %c0_11], %13 {strides = array<i32>} : memref<1x8x8xf32, #tpu.memory_space<vmem>>, vector<1x8x8xf32>,
    %c0_12 = arith.constant 0 : index
    %c0_13 = arith.constant 0 : index
    %14 = vector.load %arg4[%c0_12, %c0_13] : memref<4x8xbf16, #tpu.memory_space<vmem>>, vector<4x8xbf16>
    %15 = arith.truncf %10 : vector<8x8xf32> to vector<8x8xbf16>
    %cst_14 = arith.constant dense<0.000000e+00> : vector<4x8xf32>
    %16 = tpu.matmul %14, %15, %cst_14 {dimension_numbers = #tpu.dot_dimension_numbers<[1], [0], [0], [1], [0, 0, 1, 1], [], []>} : vector<4x8xbf16>, vector<8x8xbf16>, vector<4x8xf32> -> vector<4x8xf32>
    %17 = arith.truncf %16 : vector<4x8xf32> to vector<4x8xbf16>
    %c0_15 = arith.constant 0 : index
    %c0_16 = arith.constant 0 : index
    %18 = vector.load %arg5[%c0_15, %c0_16] : memref<8x4xbf16, #tpu.memory_space<vmem>>, vector<8x4xbf16>
    %cst_17 = arith.constant dense<0.000000e+00> : vector<4x4xf32>
    %19 = tpu.matmul %17, %18, %cst_17 {dimension_numbers = #tpu.dot_dimension_numbers<[1], [0], [0], [1], [0, 0, 1, 1], [], []>} : vector<4x8xbf16>, vector<8x4xbf16>, vector<4x4xf32> -> vector<4x4xf32>
    %cst_18 = arith.constant 1.600000e+01 : f32
    %20 = vector.broadcast %cst_18 : f32 to vector<4x4xf32>
    %21 = arith.mulf %19, %20 : vector<4x4xf32>
    %cst_19 = arith.constant 5.000000e-01 : f32
    %22 = vector.broadcast %cst_19 : f32 to vector<4x4xf32>
    %23 = arith.cmpf ogt, %21, %22 : vector<4x4xf32>
    %24 = arith.extui %23 : vector<4x4xi1> to vector<4x4xi32>
    %c0_20 = arith.constant 0 : index
    %c0_21 = arith.constant 0 : index
    %c0_22 = arith.constant 0 : index
    %25 = vector.load %arg7[%c0_20, %c0_21, %c0_22] : memref<1x4x4xi32, #tpu.memory_space<vmem>>, vector<1x4x4xi32>
    %26 = vector.shape_cast %25 : vector<1x4x4xi32> to vector<4x4xi32>
    %27 = vector.shape_cast %24 : vector<4x4xi32> to vector<1x4x4xi32>
    tpu.vector_store %arg7[%c0_20, %c0_21, %c0_22], %27 {strides = array<i32>} : memref<1x4x4xi32, #tpu.memory_space<vmem>>, vector<1x4x4xi32>,
    return
  }
  func.func @transform_0(%arg0: i32) -> (i32, i32) {
    %c0_i32 = arith.constant 0 : i32
    %c0_i32_0 = arith.constant 0 : i32
    %c0_i32_1 = arith.constant 0 : i32
    return %c0_i32, %c0_i32_0 : i32, i32
  }
  func.func @transform_1(%arg0: i32) -> (i32, i32, i32) {
    %c0_i32 = arith.constant 0 : i32
    %c0_i32_0 = arith.constant 0 : i32
    %c0_i32_1 = arith.constant 0 : i32
    return %arg0, %c0_i32, %c0_i32_0 : i32, i32, i32
  }
  func.func @transform_2(%arg0: i32) -> (i32, i32) {
    %c0_i32 = arith.constant 0 : i32
    %c0_i32_0 = arith.constant 0 : i32
    %c0_i32_1 = arith.constant 0 : i32
    return %c0_i32, %c0_i32_0 : i32, i32
  }
  func.func @transform_3(%arg0: i32) -> (i32, i32) {
    %c0_i32 = arith.constant 0 : i32
    %c0_i32_0 = arith.constant 0 : i32
    %c0_i32_1 = arith.constant 0 : i32
    return %c0_i32, %c0_i32_0 : i32, i32
  }
  func.func @transform_4(%arg0: i32) -> (i32, i32) {
    %c0_i32 = arith.constant 0 : i32
    %c0_i32_0 = arith.constant 0 : i32
    %c0_i32_1 = arith.constant 0 : i32
    return %c0_i32, %c0_i32_0 : i32, i32
  }
  func.func @transform_5(%arg0: i32) -> (i32, i32, i32) {
    %c0_i32 = arith.constant 0 : i32
    %c0_i32_0 = arith.constant 0 : i32
    %c0_i32_1 = arith.constant 0 : i32
    return %arg0, %c0_i32, %c0_i32_0 : i32, i32, i32
  }
  func.func @transform_6(%arg0: i32) -> (i32, i32, i32) {
    %c0_i32 = arith.constant 0 : i32
    %c0_i32_0 = arith.constant 0 : i32
    %c0_i32_1 = arith.constant 0 : i32
    return %arg0, %c0_i32, %c0_i32_0 : i32, i32, i32
  }
}

</mosaic_0001>

<bundles_post_ra>
// kernel: tpu_custom_call.1
= control target key start
LH: loop header
LB: loop body
LE: loop exit
PB: predicated region body
PF: predicated region fallthrough
CT: control target
= control target key end

     0   :  { %12 = vsyncpa [#allocation3], 0  ;;  %s387_s0 = inlined_call_operand.vmem [shape: bf16[8,64], index: 0, kind: input, shape index: {}]   ;;  %s388_s1 = inlined_call_operand.vmem [shape: bf16[1,64,64], index: 1, kind: input, shape index: {}]   ;;  %s389_s2 = inlined_call_operand.vmem [shape: bf16[64,8], index: 2, kind: input, shape index: {}]   ;;  %s390_s3 = inlined_call_operand.vmem [shape: bf16[4,8], index: 3, kind: input, shape index: {}]   ;;  %s391_s4 = inlined_call_operand.vmem [shape: bf16[8,4], index: 4, kind: input, shape index: {}]   ;;  %s392_s5 = inlined_call_operand.hbm [shape: f32[1,8,8], index: 5, kind: output, shape index: {0}]   ;;  %s393_s6 = inlined_call_operand.hbm [shape: s32[1,4,4], index: 6, kind: output, shape index: {1}]  }
   0x1   :  { %v247_v0 = vld [vmem:[%s388_s1 + $0x18] sm:$0xff]  ;;  %v246_v2 = vld [vmem:[%s388_s1 + $0x10] sm:$0xff] }
   0x2   :  { %v251_v1 = vld [vmem:[%s389_s2 + $0x18] sm:$0xff]  ;;  %66 = vmatpush.bf16.msra.mxu0 %v247_v0 }
   0x3   :  { %13 = vsyncpa [#allocation5], 0  ;;  %115 = vmatpush.bf16.msra.mxu1 %v251_v1  ;;  %v250_v3 = vld [vmem:[%s389_s2 + $0x10] sm:$0xff]  ;;  %v245_v4 = vld [vmem:[%s388_s1 + $0x8] sm:$0xff]  ;;  %vm58_vm0 = vcmask 523264   ;;  %vm126_vm1 = vcmask 64512  }
   0x4   :  { %v249_v5 = vld [vmem:[%s389_s2 + $0x8] sm:$0xff]  ;;  %v244_v6 = vld [vmem:[%s388_s1] sm:$0xff]  ;;  %vm133_vm3 = vcmask 1043456   ;;  %s307_s16 = smov [#allocation2]   ;;  %s308_s20 = smov [#allocation4]   ;;  %vm174_vm4 = vcmask 27648  }
   0x5   :  { %v33_v7 = vld [vmem:[%s387_s0] sm:$0xf]  ;;  %s181_s17 = sshll.u32 %s307_s16, 4  ;;  %s192_s21 = sshll.u32 %s308_s20, 4  ;;  %v309_v25 = vmov 0   ;;  %s182_s17 = int_to_ptr.vmem [resolvable:$true] %s181_s17  ;;  %s193_s21 = int_to_ptr.vmem [resolvable:$true] %s192_s21 }
   0x6   :  { %67 = vmatpush.bf16.msra.mxu0 %v246_v2  ;;  %v248_v8 = vld [vmem:[%s389_s2] sm:$0xff]  ;;  %s194_s23 = sshll.u32 %s393_s6, 4  ;;  %s195_s23 = int_to_ptr.hbm [resolvable:$true] %s194_s23 }
   0x7   :  { %116 = vmatpush.bf16.msra.mxu1 %v250_v3  ;;  %v128_v16 = vld [vmem:[%s390_s3] sm:$0x3]  ;;  %s183_s3 = sshll.u32 %s392_s5, 4  ;;  %s184_s3 = int_to_ptr.hbm [resolvable:$true] %s183_s3 }
   0x8   :  { %v151_v18 = vld [vmem:[%s391_s4] sm:$0xf] }
   0x9   :  { %v156_v19 = vsel %vm133_vm3, %v151_v18, 0 }
   0xa   :  { %68 = vmatpush.bf16.msra.mxu0 %v245_v4  ;;  %165 = vmatpush.bf16.msra.mxu3 %v156_v19 }
   0xb   :  { %117 = vmatpush.bf16.msra.mxu1 %v249_v5 }
   0xe   :  { %69 = vmatpush.bf16.msra.mxu0 %v244_v6 }
   0xf   :  { %118 = vmatpush.bf16.msra.mxu1 %v248_v8 }
  0x11   :  { %224 = vmatmul.msk.bf16.vlgmr.msra.gmra.mxu0 %vm58_vm0, %v33_v7 }
  0x8e   :  { %v71_v9 = vpop.f32.mrf.mxu0 }
  0x8f   :  { %v75_v10 = vpack.c.bf16 %v71_v9, %v71_v9 }
  0x91   :  { %241 = vmatmul.msk.bf16.vlgmr.msra.gmra.mxu1 %vm58_vm0, %v75_v10 }
  0x96   :  { %v73_v11 = vpop.f32.mrf.mxu0 }
 0x10e   :  { %v120_v12 = vpop.f32.mrf.mxu1 }
 0x10f   :  { %vm124_vm2 = vcmp.gt.f32.partialorder %v120_v12, 0.0 }
 0x110   :  { %v125_v13 = vsel %vm124_vm2, 1.0, %v120_v12 }
 0x111   :  { %v129_v14 = vpack.c.bf16 %v125_v13, %v125_v13  ;;  %127 = vst.msk [vmem:[#allocation2] sm:$0xff] %vm126_vm1, %v125_v13 }
 0x112   :  { %186 = dma.vmem_to_hbm [thread:$0]  %s182_s17, 128, %s184_s3, [#allocation3]  }
 0x113   :  { %v135_v15 = vsel %vm133_vm3, %v129_v14, 0 }
 0x114   :  { %144 = vmatpush.bf16.msra.mxu2 %v135_v15 }
 0x116   :  { %v122_v17 = vpop.f32.mrf.mxu1 }
 0x117   :  { %242 = vmatmul.msk.bf16.vlgmr.msra.gmra.mxu2 %vm126_vm1, %v128_v16 }
 0x19a   :  { %v146_v20 = vpop.f32.mrf.mxu2 }
 0x19b   :  { %v150_v21 = vpack.c.bf16 %v146_v20, %v146_v20 }
 0x19d   :  { %243 = vmatmul.msk.bf16.vlgmr.msra.gmra.mxu3 %vm126_vm1, %v150_v21 }
 0x1a2   :  { %v148_v22 = vpop.f32.mrf.mxu2 }
 0x220   :  { %v167_v23 = vpop.f32.mrf.mxu3 }
 0x221   :  { %v171_v24 = vmul.f32 16.0, %v167_v23 }
 0x223   :  { %vm172_vm5 = vcmp.gt.f32.partialorder %v171_v24, 0.5 }
 0x224   :  { %v173_v26 = vsel %vm172_vm5, 1, %v309_v25 }
 0x225   :  { %175 = vst.msk [vmem:[#allocation4] sm:$0xf] %vm174_vm4, %v173_v26 }
 0x226   :  { %197 = dma.vmem_to_hbm [thread:$0]  %s193_s21, 64, %s195_s23, [#allocation5]  }
 0x228   :  { %v169_v27 = vpop.f32.mrf.mxu3 }
 0x229   :  { %303 = dma.done.wait [#allocation3], 128  }
 0x22a   :  { %304 = vsyncadd [#allocation3], 4294967168 }
 0x22b   :  { %305 = dma.done.wait [#allocation5], 64  }
 0x22c   :  { %306 = vsyncadd [#allocation5], 4294967232 }
 0x22d   :  { %206 = vsyncpa [#allocation3], 1 }
 0x22e   :  { %207 = vsyncpa [#allocation5], 1 }

</bundles_post_ra>
